<compile_context>
chip_gen: v7x
topology: tpu7x:2x2x1
jax: 0.10.0
libtpu: 0.0.40
codegen_flags: <defaults>
</compile_context>

<pallas_src>
import jax
import jax.numpy as jnp
from jax.experimental import pallas as pl
from jax.experimental.pallas import tpu as pltpu


def _output_layer_kernel(x_ref, drop_ref,
                         w_o2e_ref, b_o2e_ref,
                         w_e2s_ref, b_e2s_ref,
                         w_e2q_ref, b_e2q_ref,
                         scores_ref, scores_q_ref):
    x = x_ref[...]
    # o2e projection: (tm, H) @ (H, E) + (1, E)
    e = jnp.dot(x, w_o2e_ref[...], preferred_element_type=jnp.float32)
    e = e + b_o2e_ref[...]
    # Fused inverted dropout: drop_ref holds 0 or 1/(1-p); all-ones in eval.
    e = e * drop_ref[...]
    # e2s: raw candidate scores.
    scores = jnp.dot(e, w_e2s_ref[...], preferred_element_type=jnp.float32)
    scores = scores + b_e2s_ref[...]
    # e2q -> softmax over candidates (full candidate dim visible per tile).
    lq = jnp.dot(e, w_e2q_ref[...], preferred_element_type=jnp.float32)
    lq = lq + b_e2q_ref[...]
    lq = lq - jnp.max(lq, axis=-1, keepdims=True)
    p = jnp.exp(lq)
    scores_q = p / jnp.sum(p, axis=-1, keepdims=True)

    scores_ref[...] = scores.astype(scores_ref.dtype)
    scores_q_ref[...] = scores_q.astype(scores_q_ref.dtype)


def _dropout_scale(shape, p, training, rng):
    """Inverted-dropout scale tensor: 0 or 1/(1-p) per element; ones in eval."""
    if not training or p <= 0.0:
        return jnp.ones(shape, jnp.float32)
    if rng is None:
        rng = jax.random.PRNGKey(0)
    keep = jax.random.bernoulli(rng, 1.0 - p, shape)
    return keep.astype(jnp.float32) / jnp.float32(1.0 - p)


def output_layer_forward(x, params, *, dropout_p=0.1, training=False,
                         rng=None, row_tile=128):
    """Pallas implementation of OutputLayer.forward (numsoftmax == 1).

    x: (bsz, seqlen, hidden) float32.
    params: dict with
       w_o2e (hidden, emb),  b_o2e (emb,)
       w_e2s (emb, ncand),   b_e2s (ncand,)
       w_e2q (emb, ncand),   b_e2q (ncand,)
    (weights stored transposed w.r.t. torch.nn.Linear for lane-dense matmuls)
    Returns (scores, scores_q), each (bsz, seqlen, ncand).
    """
    bsz, seqlen, hidden = x.shape
    emb = params["w_o2e"].shape[1]
    ncand = params["w_e2s"].shape[1]

    m = bsz * seqlen
    x2d = x.reshape(m, hidden).astype(jnp.float32)
    drop = _dropout_scale((m, emb), dropout_p, training, rng)

    # Row-tile size: multiple of 8 (sublane), padded grid over rows.
    if m >= row_tile:
        tm = row_tile
    else:
        tm = -(-m // 8) * 8
    m_pad = pl.cdiv(m, tm) * tm
    if m_pad != m:
        x2d = jnp.pad(x2d, ((0, m_pad - m), (0, 0)))
        drop = jnp.pad(drop, ((0, m_pad - m), (0, 0)), constant_values=1.0)

    grid = (m_pad // tm,)

    scores, scores_q = pl.pallas_call(
        _output_layer_kernel,
        out_shape=(
            jax.ShapeDtypeStruct((m_pad, ncand), jnp.float32),
            jax.ShapeDtypeStruct((m_pad, ncand), jnp.float32),
        ),
        grid=grid,
        in_specs=[
            pl.BlockSpec((tm, hidden), lambda i: (i, 0)),      # x row tile
            pl.BlockSpec((tm, emb), lambda i: (i, 0)),         # dropout scale
            pl.BlockSpec((hidden, emb), lambda i: (0, 0)),     # W_o2e (resident)
            pl.BlockSpec((1, emb), lambda i: (0, 0)),          # b_o2e
            pl.BlockSpec((emb, ncand), lambda i: (0, 0)),      # W_e2s
            pl.BlockSpec((1, ncand), lambda i: (0, 0)),        # b_e2s
            pl.BlockSpec((emb, ncand), lambda i: (0, 0)),      # W_e2q
            pl.BlockSpec((1, ncand), lambda i: (0, 0)),        # b_e2q
        ],
        out_specs=(
            pl.BlockSpec((tm, ncand), lambda i: (i, 0)),
            pl.BlockSpec((tm, ncand), lambda i: (i, 0)),
        ),
        compiler_params=pltpu.CompilerParams(
            dimension_semantics=("parallel",)),
    )(
        x2d, drop,
        params["w_o2e"], params["b_o2e"].reshape(1, -1),
        params["w_e2s"], params["b_e2s"].reshape(1, -1),
        params["w_e2q"], params["b_e2q"].reshape(1, -1),
    )

    scores = scores[:m].reshape(bsz, seqlen, ncand)
    scores_q = scores_q[:m].reshape(bsz, seqlen, ncand)
    return scores, scores_q


def _reference(x, drop2d, params):
    """Pure-JAX reference of the same forward (given an explicit dropout mask)."""
    bsz, seqlen, hidden = x.shape
    x2d = x.reshape(-1, hidden).astype(jnp.float32)
    e = (x2d @ params["w_o2e"] + params["b_o2e"]) * drop2d
    scores = e @ params["w_e2s"] + params["b_e2s"]
    lq = e @ params["w_e2q"] + params["b_e2q"]
    scores_q = jax.nn.softmax(lq, axis=-1)
    n = scores.shape[-1]
    return scores.reshape(bsz, seqlen, n), scores_q.reshape(bsz, seqlen, n)


if __name__ == "__main__":
    key = jax.random.PRNGKey(0)
    k_x, k1, k2, k3, k4, k5, k6, k_drop = jax.random.split(key, 8)

    bsz, seqlen, hidden, emb, ncand = 2, 8, 64, 32, 100
    dropout_p = 0.1

    x = jax.random.normal(k_x, (bsz, seqlen, hidden), jnp.float32)
    params = {
        "w_o2e": 0.1 * jax.random.normal(k1, (hidden, emb), jnp.float32),
        "b_o2e": 0.1 * jax.random.normal(k2, (emb,), jnp.float32),
        "w_e2s": 0.1 * jax.random.normal(k3, (emb, ncand), jnp.float32),
        "b_e2s": 0.1 * jax.random.normal(k4, (ncand,), jnp.float32),
        "w_e2q": 0.1 * jax.random.normal(k5, (emb, ncand), jnp.float32),
        "b_e2q": 0.1 * jax.random.normal(k6, (ncand,), jnp.float32),
    }

    # Eval mode (dropout == identity): exact check vs pure-JAX reference.
    scores, scores_q = output_layer_forward(
        x, params, dropout_p=dropout_p, training=False, row_tile=8)
    scores, scores_q = jax.block_until_ready((scores, scores_q))
    ref_s, ref_q = _reference(
        x, jnp.ones((bsz * seqlen, emb), jnp.float32), params)
    ok = bool(jnp.allclose(scores, ref_s, rtol=2e-3, atol=2e-3))
    ok = ok and bool(jnp.allclose(scores_q, ref_q, rtol=2e-3, atol=2e-3))

    # Training mode: rebuild the identical dropout mask for the reference.
    scores_t, scores_qt = output_layer_forward(
        x, params, dropout_p=dropout_p, training=True, rng=k_drop, row_tile=8)
    scores_t, scores_qt = jax.block_until_ready((scores_t, scores_qt))
    drop = _dropout_scale((bsz * seqlen, emb), dropout_p, True, k_drop)
    ref_st, ref_qt = _reference(x, drop, params)
    ok = ok and bool(jnp.allclose(scores_t, ref_st, rtol=2e-3, atol=2e-3))
    ok = ok and bool(jnp.allclose(scores_qt, ref_qt, rtol=2e-3, atol=2e-3))

    if ok:
        print("KERNEL_OK")
    else:
        raise SystemExit("mismatch vs reference in OutputLayer kernel output")
</pallas_src>

<mosaic_0001>
module attributes {stable_mosaic.version = 11 : i64} {
  func.func @_output_layer_kernel(%arg0: i32, %arg1: memref<8x64xf32, #tpu.memory_space<vmem>>, %arg2: memref<8x32xf32, #tpu.memory_space<vmem>>, %arg3: memref<64x32xf32, #tpu.memory_space<vmem>>, %arg4: memref<1x32xf32, #tpu.memory_space<vmem>>, %arg5: memref<32x100xf32, #tpu.memory_space<vmem>>, %arg6: memref<1x100xf32, #tpu.memory_space<vmem>>, %arg7: memref<32x100xf32, #tpu.memory_space<vmem>>, %arg8: memref<1x100xf32, #tpu.memory_space<vmem>>, %arg9: memref<8x100xf32, #tpu.memory_space<vmem>>, %arg10: memref<8x100xf32, #tpu.memory_space<vmem>>) attributes {dimension_semantics = [#tpu.dimension_semantics<parallel>], iteration_bounds = array<i64: 2>, scalar_prefetch = 0 : i64, scratch_operands = 0 : i64, tpu.core_type = #tpu.core_type<tc>, window_params = [{transform_indices = @transform_0, window_bounds = array<i64: 8, 64>}, {transform_indices = @transform_1, window_bounds = array<i64: 8, 32>}, {pipeline_mode = #tpu.pipeline_mode<synchronous>, transform_indices = @transform_2, window_bounds = array<i64: 64, 32>}, {pipeline_mode = #tpu.pipeline_mode<synchronous>, transform_indices = @transform_3, window_bounds = array<i64: 1, 32>}, {pipeline_mode = #tpu.pipeline_mode<synchronous>, transform_indices = @transform_4, window_bounds = array<i64: 32, 100>}, {pipeline_mode = #tpu.pipeline_mode<synchronous>, transform_indices = @transform_5, window_bounds = array<i64: 1, 100>}, {pipeline_mode = #tpu.pipeline_mode<synchronous>, transform_indices = @transform_6, window_bounds = array<i64: 32, 100>}, {pipeline_mode = #tpu.pipeline_mode<synchronous>, transform_indices = @transform_7, window_bounds = array<i64: 1, 100>}, {transform_indices = @transform_8, window_bounds = array<i64: 8, 100>}, {transform_indices = @transform_9, window_bounds = array<i64: 8, 100>}]} {
    %c0 = arith.constant 0 : index
    %c0_0 = arith.constant 0 : index
    %0 = vector.load %arg1[%c0, %c0_0] : memref<8x64xf32, #tpu.memory_space<vmem>>, vector<8x64xf32>
    %c0_1 = arith.constant 0 : index
    %c0_2 = arith.constant 0 : index
    %1 = vector.load %arg3[%c0_1, %c0_2] : memref<64x32xf32, #tpu.memory_space<vmem>>, vector<64x32xf32>
    %cst = arith.constant dense<0.000000e+00> : vector<8x32xf32>
    %2 = tpu.matmul %0, %1, %cst {dimension_numbers = #tpu.dot_dimension_numbers<[1], [0], [0], [1], [0, 0, 1, 1], [], []>} : vector<8x64xf32>, vector<64x32xf32>, vector<8x32xf32> -> vector<8x32xf32>
    %c0_3 = arith.constant 0 : index
    %c0_4 = arith.constant 0 : index
    %3 = vector.load %arg4[%c0_3, %c0_4] : memref<1x32xf32, #tpu.memory_space<vmem>>, vector<1x32xf32>
    %4 = vector.broadcast %3 : vector<1x32xf32> to vector<8x32xf32>
    %5 = arith.addf %2, %4 : vector<8x32xf32>
    %c0_5 = arith.constant 0 : index
    %c0_6 = arith.constant 0 : index
    %6 = vector.load %arg2[%c0_5, %c0_6] : memref<8x32xf32, #tpu.memory_space<vmem>>, vector<8x32xf32>
    %7 = arith.mulf %5, %6 : vector<8x32xf32>
    %c0_7 = arith.constant 0 : index
    %c0_8 = arith.constant 0 : index
    %8 = vector.load %arg5[%c0_7, %c0_8] : memref<32x100xf32, #tpu.memory_space<vmem>>, vector<32x100xf32>
    %cst_9 = arith.constant dense<0.000000e+00> : vector<8x100xf32>
    %9 = tpu.matmul %7, %8, %cst_9 {dimension_numbers = #tpu.dot_dimension_numbers<[1], [0], [0], [1], [0, 0, 1, 1], [], []>} : vector<8x32xf32>, vector<32x100xf32>, vector<8x100xf32> -> vector<8x100xf32>
    %c0_10 = arith.constant 0 : index
    %c0_11 = arith.constant 0 : index
    %10 = vector.load %arg6[%c0_10, %c0_11] : memref<1x100xf32, #tpu.memory_space<vmem>>, vector<1x100xf32>
    %11 = vector.broadcast %10 : vector<1x100xf32> to vector<8x100xf32>
    %12 = arith.addf %9, %11 : vector<8x100xf32>
    %c0_12 = arith.constant 0 : index
    %c0_13 = arith.constant 0 : index
    %13 = vector.load %arg7[%c0_12, %c0_13] : memref<32x100xf32, #tpu.memory_space<vmem>>, vector<32x100xf32>
    %cst_14 = arith.constant dense<0.000000e+00> : vector<8x100xf32>
    %14 = tpu.matmul %7, %13, %cst_14 {dimension_numbers = #tpu.dot_dimension_numbers<[1], [0], [0], [1], [0, 0, 1, 1], [], []>} : vector<8x32xf32>, vector<32x100xf32>, vector<8x100xf32> -> vector<8x100xf32>
    %c0_15 = arith.constant 0 : index
    %c0_16 = arith.constant 0 : index
    %15 = vector.load %arg8[%c0_15, %c0_16] : memref<1x100xf32, #tpu.memory_space<vmem>>, vector<1x100xf32>
    %16 = vector.broadcast %15 : vector<1x100xf32> to vector<8x100xf32>
    %17 = arith.addf %14, %16 : vector<8x100xf32>
    %cst_17 = arith.constant dense<0xFF800000> : vector<8xf32>
    %18 = vector.multi_reduction <maximumf>, %17, %cst_17 [1] : vector<8x100xf32> to vector<8xf32>
    %19 = vector.shape_cast %18 : vector<8xf32> to vector<8x1xf32>
    %20 = vector.broadcast %19 : vector<8x1xf32> to vector<8x100xf32>
    %21 = arith.subf %17, %20 : vector<8x100xf32>
    %22 = math.exp %21 : vector<8x100xf32>
    %cst_18 = arith.constant dense<0.000000e+00> : vector<8xf32>
    %23 = vector.multi_reduction <add>, %22, %cst_18 [1] : vector<8x100xf32> to vector<8xf32>
    %24 = vector.shape_cast %23 : vector<8xf32> to vector<8x1xf32>
    %25 = vector.broadcast %24 : vector<8x1xf32> to vector<8x100xf32>
    %26 = arith.divf %22, %25 : vector<8x100xf32>
    %c0_19 = arith.constant 0 : index
    %c0_20 = arith.constant 0 : index
    %27 = vector.load %arg9[%c0_19, %c0_20] : memref<8x100xf32, #tpu.memory_space<vmem>>, vector<8x100xf32>
    tpu.vector_store %arg9[%c0_19, %c0_20], %12 {strides = array<i32>} : memref<8x100xf32, #tpu.memory_space<vmem>>, vector<8x100xf32>,
    %c0_21 = arith.constant 0 : index
    %c0_22 = arith.constant 0 : index
    %28 = vector.load %arg10[%c0_21, %c0_22] : memref<8x100xf32, #tpu.memory_space<vmem>>, vector<8x100xf32>
    tpu.vector_store %arg10[%c0_21, %c0_22], %26 {strides = array<i32>} : memref<8x100xf32, #tpu.memory_space<vmem>>, vector<8x100xf32>,
    return
  }
  func.func @transform_0(%arg0: i32) -> (i32, i32) {
    %c0_i32 = arith.constant 0 : i32
    %c0_i32_0 = arith.constant 0 : i32
    return %arg0, %c0_i32 : i32, i32
  }
  func.func @transform_1(%arg0: i32) -> (i32, i32) {
    %c0_i32 = arith.constant 0 : i32
    %c0_i32_0 = arith.constant 0 : i32
    return %arg0, %c0_i32 : i32, i32
  }
  func.func @transform_2(%arg0: i32) -> (i32, i32) {
    %c0_i32 = arith.constant 0 : i32
    %c0_i32_0 = arith.constant 0 : i32
    %c0_i32_1 = arith.constant 0 : i32
    return %c0_i32, %c0_i32_0 : i32, i32
  }
  func.func @transform_3(%arg0: i32) -> (i32, i32) {
    %c0_i32 = arith.constant 0 : i32
    %c0_i32_0 = arith.constant 0 : i32
    %c0_i32_1 = arith.constant 0 : i32
    return %c0_i32, %c0_i32_0 : i32, i32
  }
  func.func @transform_4(%arg0: i32) -> (i32, i32) {
    %c0_i32 = arith.constant 0 : i32
    %c0_i32_0 = arith.constant 0 : i32
    %c0_i32_1 = arith.constant 0 : i32
    return %c0_i32, %c0_i32_0 : i32, i32
  }
  func.func @transform_5(%arg0: i32) -> (i32, i32) {
    %c0_i32 = arith.constant 0 : i32
    %c0_i32_0 = arith.constant 0 : i32
    %c0_i32_1 = arith.constant 0 : i32
    return %c0_i32, %c0_i32_0 : i32, i32
  }
  func.func @transform_6(%arg0: i32) -> (i32, i32) {
    %c0_i32 = arith.constant 0 : i32
    %c0_i32_0 = arith.constant 0 : i32
    %c0_i32_1 = arith.constant 0 : i32
    return %c0_i32, %c0_i32_0 : i32, i32
  }
  func.func @transform_7(%arg0: i32) -> (i32, i32) {
    %c0_i32 = arith.constant 0 : i32
    %c0_i32_0 = arith.constant 0 : i32
    %c0_i32_1 = arith.constant 0 : i32
    return %c0_i32, %c0_i32_0 : i32, i32
  }
  func.func @transform_8(%arg0: i32) -> (i32, i32) {
    %c0_i32 = arith.constant 0 : i32
    %c0_i32_0 = arith.constant 0 : i32
    return %arg0, %c0_i32 : i32, i32
  }
  func.func @transform_9(%arg0: i32) -> (i32, i32) {
    %c0_i32 = arith.constant 0 : i32
    %c0_i32_0 = arith.constant 0 : i32
    return %arg0, %c0_i32 : i32, i32
  }
}

</mosaic_0001>

<bundles_post_ra>
// kernel: tpu_custom_call.1
= control target key start
LH: loop header
LB: loop body
LE: loop exit
PB: predicated region body
PF: predicated region fallthrough
CT: control target
= control target key end

     0   :  { %15 = vsyncpa [#allocation3], 0  ;;  %s1271_s0 = inlined_call_operand.vmem [shape: f32[16,64], index: 0, kind: input, shape index: {}]   ;;  %s1272_s1 = inlined_call_operand.vmem [shape: f32[16,32], index: 1, kind: input, shape index: {}]   ;;  %s1273_s2 = inlined_call_operand.vmem [shape: f32[64,32], index: 2, kind: input, shape index: {}]   ;;  %s1274_s3 = inlined_call_operand.vmem [shape: f32[1,32], index: 3, kind: input, shape index: {}]   ;;  %s1275_s4 = inlined_call_operand.vmem [shape: f32[32,100], index: 4, kind: input, shape index: {}]   ;;  %s1276_s5 = inlined_call_operand.vmem [shape: f32[1,100], index: 5, kind: input, shape index: {}]   ;;  %s1277_s6 = inlined_call_operand.vmem [shape: f32[32,100], index: 6, kind: input, shape index: {}]   ;;  %s1278_s7 = inlined_call_operand.vmem [shape: f32[1,100], index: 7, kind: input, shape index: {}]   ;;  %s1279_s8 = inlined_call_operand.hbm [shape: f32[16,100], index: 8, kind: output, shape index: {0}]   ;;  %s1280_s9 = inlined_call_operand.hbm [shape: f32[16,100], index: 9, kind: output, shape index: {1}]  }
   0x1   :  { %17 = vsyncpa [#allocation3 + $0x1], 0 }
   0x2   :  { %18 = vsyncpa [#allocation5], 0 }
   0x3   :  { %20 = vsyncpa [#allocation5 + $0x1], 0  ;;  %s1069_s30 = smov 0   ;;  %s1071_s10 = smov 0  }
   0x4   :  { %s1073_s11 = smov 0   ;;  %s1075_s12 = smov 0  }
   0x5 LB: > { %s1090_s13 = sadd.s32 4294967295, %s1012_s12   ;;  %s763_s14 = sadd.s32 4294967294, %s1012_s12   ;;  %s1012_s12 = sphi %s1075_s12, %s1290_s12   ;;  %s1008_s11 = sphi %s1073_s11, %s1289_s11   ;;  %s1004_s10 = sphi %s1071_s10, %s1288_s10   ;;  %s1000_s30 = sphi %s1069_s30, %s1287_s30  }
   0x6   : > { %s1094_s15 = sadd.s32 1, %s1012_s12   ;;  %s211_s16 = sadd.s32 1, %s1008_s11 }
   0x7   : > { %s208_s17 = ssub.s32 %s1012_s12, %s1094_s15  ;;  %p221_p0 = scmp.ne.s32.totalorder %s1008_s11, %s1004_s10 }
   0x8   : > { %p209_p1 = scmp.eq.s32.totalorder %s208_s17, 0  ;;  %p222_p2 = scmp.eq.s32.totalorder %s1090_s13, 1 }
   0x9   : > { %p227_p3 = scmp.ne.s32.totalorder %s1004_s10, %s1000_s30  ;;  %p228_p4 = scmp.eq.s32.totalorder %s763_s14, 1 }
   0xa   : > { %s1105_s18 = scalar_select %p209_p1, %s1008_s11, %s211_s16  }
   0xb   : > { %p1107_p5 = por %p222_p2, %p221_p0  ;;  %p1111_p6 = por %p228_p4, %p227_p3 }
   0xc   : > { %p766_p7 = scmp.ge.s32.totalorder %s1012_s12, 1  ;;  %p304_p8 = scmp.lt.s32.totalorder %s1012_s12, 3 }
   0xe   : > { %p305_p9 = pnand %p766_p7, %p304_p8 }
   0xf   : > { %v357_v0 = vld [vmem:[%s1273_s2] sm:$0xff] (!%p305_p9)  ;;  %v358_v1 = vld [vmem:[%s1273_s2 + $0x8] sm:$0xff] (!%p305_p9)  ;;  %v359_v2 = vld [vmem:[%s1273_s2 + $0x10] sm:$0xff] (!%p305_p9)  ;;  %v1014_v3 = vmov (!%p305_p9), 0.0|0.0   ;;  %vm1015_vm0 = vmmov (!%p305_p9), 0   ;;  %v1016_v6 = vmov (!%p305_p9), 0.0  }
  0x10   : > { %308 = sbr.rel (%p305_p9) target bundleno = 799 (0x31f), region = 52  ;;  %843 = vmatprep.subr.bf16.mxu0 (!%p305_p9), %v1014_v3  ;;  %v844_v4 = vpack.c.bf16 (!%p305_p9), %v358_v1, %v357_v0  ;;  %v360_v5 = vld [vmem:[%s1273_s2 + $0x18] sm:$0xff] (!%p305_p9)  ;;  %818 = vmatprep.mubr.msk.f32.mxu0 (!%p305_p9), %vm1015_vm0, %v1016_v6  ;;  %p348_p10 = scmp.lt.s32.totalorder (!%p305_p9), %s1090_s13, 1  ;;  %v448_v7 = vld [vmem:[%s1275_s4] sm:$0xff] (!%p305_p9)  ;;  %v449_v9 = vld [vmem:[%s1275_s4 + $0x8] sm:$0xff] (!%p305_p9)  ;;  %vm372_vm1 = vcmask (!%p305_p9), 523264  }
  0x11   : > { %855 = vmatprep.subr.bf16.mxu1 (!%p305_p9), %v1014_v3  ;;  %829 = vmatprep.mubr.msk.f32.mxu1 (!%p305_p9), %vm1015_vm0, %v1016_v6  ;;  %v847_v8 = vpack.c.bf16 (!%p305_p9), %v360_v5, %v359_v2  ;;  %v361_v10 = vld [vmem:[%s1273_s2 + $0x20] sm:$0xff] (!%p305_p9)  ;;  %v362_v11 = vld [vmem:[%s1273_s2 + $0x28] sm:$0xff] (!%p305_p9)  ;;  %v856_v12 = vpack.c.bf16 (!%p305_p9), %v449_v9, %v448_v7  ;;  %v363_v14 = vld [vmem:[%s1273_s2 + $0x30] sm:$0xff] (!%p305_p9)  ;;  %vm459_vm2 = vcmask (!%p305_p9), 261120   ;;  %s1180_s27 = sand.u32 (!%p305_p9), 1, %s1004_s10   ;;  %vm614_vm3 = vcmask (!%p305_p9), 818176  }
  0x12   : > { %845 = vmatpush3.bf16.msra.mxu0 (!%p305_p9), %v844_v4  ;;  %v850_v13 = vpack.c.bf16 (!%p305_p9), %v362_v11, %v361_v10  ;;  %v364_v15 = vld [vmem:[%s1273_s2 + $0x38] sm:$0xff] (!%p305_p9)  ;;  %v450_v18 = vld [vmem:[%s1275_s4 + $0x10] sm:$0xff] (!%p305_p9)  ;;  %v771_v21 = vld [vmem:[%s1274_s3] ss:$0 sm:$0xff] (!%p305_p9)  ;;  %s1282_s23 = sshll.u32 (!%p305_p9), %s1090_s13, 7  ;;  %s629_s29 = scalar_lea.sflag (!%p305_p9), [#allocation3], %s1180_s27 }
  0x13   : > { %846 = vmatprep.subr.bf16.mxu0 (!%p305_p9), %v1014_v3  ;;  %857 = vmatpush3.bf16.msra.mxu1 (!%p305_p9), %v856_v12  ;;  %v853_v16 = vpack.c.bf16 (!%p305_p9), %v364_v15, %v363_v14  ;;  %v451_v19 = vld [vmem:[%s1275_s4 + $0x18] sm:$0xff] (!%p305_p9)  ;;  %v533_v22 = vld [vmem:[%s1277_s6] sm:$0xff] (!%p305_p9)  ;;  %v534_v23 = vld [vmem:[%s1277_s6 + $0x8] sm:$0xff] (!%p305_p9)  ;;  %s1200_s26 = scalar_lea.hbm (!%p305_p9), %s1279_s8, %s1282_s23 }
  0x14   : > { %858 = vmatprep.subr.bf16.mxu1 (!%p305_p9), %v1014_v3  ;;  %v859_v20 = vpack.c.bf16 (!%p305_p9), %v451_v19, %v450_v18  ;;  %v862_v28 = vpack.c.bf16 (!%p305_p9), %v534_v23, %v533_v22  ;;  %v535_v30 = vld [vmem:[%s1277_s6 + $0x10] sm:$0xff] (!%p305_p9)  ;;  %v536_v31 = vld [vmem:[%s1277_s6 + $0x18] sm:$0xff] (!%p305_p9)  ;;  %v773_v33 = vld [vmem:[%s1276_s5] ss:$0 sm:$0xff] (!%p305_p9) }
  0x15   : > { %v865_v32 = vpack.c.bf16 (!%p305_p9), %v536_v31, %v535_v30  ;;  %v775_v37 = vld [vmem:[%s1278_s7] ss:$0 sm:$0xff] (!%p305_p9) }
  0x16   : > { %848 = vmatpush3.bf16.msra.mxu0 (!%p305_p9), %v847_v8 }
  0x17   : > { %s349_s25 = scalar_select %p348_p10, %s1090_s13, 1  ;;  %849 = vmatprep.subr.bf16.mxu0 %v1014_v3  ;;  %860 = vmatpush3.bf16.msra.mxu1 %v859_v20 }
  0x18   : > { %861 = vmatprep.subr.bf16.mxu1 %v1014_v3 }
  0x19   : > { %s769_s14 = sshll.u32 %s349_s25, 3 }
  0x1a   : > { %851 = vmatpush3.bf16.msra.mxu0 %v850_v13  ;;  %s351_s21 = scalar_lea.vmem %s1271_s0, %s769_s14  ;;  %s355_s28 = scalar_lea.vmem %s1272_s1, %s769_s14 }
  0x1b   : > { %852 = vmatprep.subr.bf16.mxu0 %v1014_v3  ;;  %v356_v17 = vld [vmem:[%s351_s21] sm:$0xff]  ;;  %s1017_s21 = smov [#allocation2]  }
  0x1c   : > { %v446_v25 = vld [vmem:[%s355_s28] sm:$0xff]  ;;  %s1281_s28 = sshll.u32 %s1180_s27, 3  ;;  %s922_s22 = sshll.u32 %s1017_s21, 4  ;;  %s923_s22 = int_to_ptr.vmem [resolvable:$false] %s922_s22 }
  0x1d   : > { %s340_s17 = scalar_lea.vmem [#allocation2], %s1281_s28  ;;  %s924_s28 = scalar_lea.vmem %s923_s22, 256 }
  0x1e   : > { %854 = vmatpush3.bf16.msra.mxu0 %v853_v16  ;;  %s647_s25 = sshll.u32 %s340_s17, 4  ;;  %s648_s25 = int_to_ptr.vmem [resolvable:$true] %s647_s25 }
  0x1f   : > { %s918_s16 = scalar_lea.vmem %s648_s25, 128  ;;  %p925_p0 = scmp.lt.s32.totalorder %s648_s25, %s923_s22 }
  0x20   : > { %p919_p11 = scmp.ne.s32.totalorder %s648_s25, %s918_s16  ;;  %p926_p1 = scmp.lt.s32.totalorder %s924_s28, %s918_s16 }
  0x21   : > { %819 = vmatmul.mubr.msk.f32.vlgmr.msra.gmra.mrb[0].mxu0 %vm372_vm1, %v356_v17 }
  0x22   : > { %p920_p12 = pnand %p919_p11, %p1107_p5  ;;  %p927_p2 = por %p926_p1, %p925_p0 }
  0x24   : > { %p921_p13 = pneg %p920_p12 }
  0x26   : > { %p928_p3 = pnand %p927_p2, %p921_p13 }
  0xf4   : > { %v442_v24 = vpop.f32.mrb[0].mxu0 }
  0xf5   : > { %v443_v26 = vadd.f32 %v771_v21, %v442_v24  ;;  %v820_v27 = vpop.f32.mrb[1].mxu0 }
  0xf7   : > { %v447_v29 = vmul.f32 %v446_v25, %v443_v26 }
  0xf9   : > { %830 = vmatmul.mubr.msk.f32.vlgmr.msra.gmra.mrb[0].mxu1 %vm459_vm2, %v447_v29 }
  0xfa   : > { %863 = vmatpush3.bf16.msra.mxu1 %v862_v28  ;;  %840 = vmatprep.mubr.msk.f32.mxu1 %vm1015_vm0, %v1016_v6 }
  0xfb   : > { %864 = vmatprep.subr.bf16.mxu1 %v1014_v3 }
  0xfe   : > { %866 = vmatpush3.bf16.msra.mxu1 %v865_v32 }
 0x101   : > { %841 = vmatmul.mubr.msk.f32.vlgmr.msra.gmra.mrb[2].mxu1 %vm459_vm2, %v447_v29 }
 0x1cc   : > { %v529_v34 = vpop.f32.mrb[0].mxu1 }
 0x1cd   : > { %v530_v35 = vadd.f32 %v773_v33, %v529_v34  ;;  %v831_v36 = vpop.f32.mrb[1].mxu1 }
 0x1cf   : > { %626 = vst.msk [vmem:[%s340_s17] sm:$0xff] %vm614_vm3, %v530_v35 }
 0x1d4   : > { %v610_v38 = vpop.f32.mrb[2].mxu1 }
 0x1d5   : > { %v611_v39 = vadd.f32 %v775_v37, %v610_v38  ;;  %v842_v40 = vpop.f32.mrb[3].mxu1 }
 0x1d7   : > { %v615_v41 = vsel %vm614_vm3, %v611_v39, -inf }
 0x1d8   : > { %616 = vmax.xlane.f32.xlu0 %v615_v41 }
 0x265   : > { %v617_v42 = vpop.xlane.xlu0 %616 }
 0x266   : > { %v618_v43 = vsub.f32 %v611_v39, %v617_v42 }
 0x268   : > { %v619_v44 = vmul.f32 1.442695, %v618_v43 }
 0x26a   : > { %914 = vpow2.f32 %v619_v44 }
 0x274   : > { %v915_v45 = vpop.eup %914 }
 0x275   : > { %v621_v46 = vsel %vm614_vm3, %v915_v45, 0.0 }
 0x276   : > { %622 = vadd.xlane.f32.xlu0 %v621_v46 }
 0x277   : > { %931 = shalt.err (!%p928_p3)
}
 0x278   : > { %s932_s17 = scalar_lea.hbm %s1200_s26, 128  ;;  %s936_s21 = scalar_lea.hbm %s1279_s8, 256 }
 0x279   : > { %p933_p4 = scmp.ne.s32.totalorder %s1200_s26, %s932_s17  ;;  %p937_p9 = scmp.lt.u32.totalorder %s1200_s26, %s1279_s8 }
 0x27a   : > { %p938_p10 = scmp.lt.u32.totalorder %s936_s21, %s932_s17  ;;  %p940_p12 = scmp.lt.u32.totalorder %s932_s17, %s1200_s26 }
 0x27b   : > { %p934_p7 = pnand %p933_p4, %p1107_p5 }
 0x27c   : > { %p939_p11 = por %p938_p10, %p937_p9 }
 0x27d   : > { %p935_p8 = pneg %p934_p7 }
 0x27e   : > { %p941_p13 = por %p940_p12, %p939_p11 }
 0x280   : > { %p942_p0 = pnand %p941_p13, %p935_p8 }
 0x282   : > { %945 = shalt.err (!%p942_p0)
}
 0x283   : > { %867 = dma.vmem_to_hbm [thread:$0]  (%p1107_p5), %s648_s25, 128, %s1200_s26, %s629_s29  }
 0x284   : > { %s1285_s28 = sshll.u32 %s1180_s27, 3  ;;  %s1286_s14 = sshll.u32 %s1090_s13, 7 }
 0x285   : > { %s347_s16 = scalar_lea.vmem [#allocation4], %s1285_s28  ;;  %s1227_s21 = scalar_lea.hbm %s1280_s9, %s1286_s14 }
 0x286   : > { %s660_s23 = sshll.u32 %s347_s16, 4  ;;  %s634_s26 = scalar_lea.sflag [#allocation5], %s1180_s27  ;;  %s1229_s23 = int_to_ptr.vmem [resolvable:$true] %s660_s23 }
 0x287   : > { %s946_s25 = scalar_lea.vmem %s1229_s23, 128  ;;  %s1018_s29 = smov [#allocation4]  }
 0x288   : > { %p947_p1 = scmp.ne.s32.totalorder %s1229_s23, %s946_s25  ;;  %s950_s13 = sshll.u32 %s1018_s29, 4  ;;  %s951_s13 = int_to_ptr.vmem [resolvable:$false] %s950_s13 }
 0x289   : > { %s952_s22 = scalar_lea.vmem %s951_s13, 256  ;;  %p953_p4 = scmp.lt.s32.totalorder %s1229_s23, %s951_s13 }
 0x28a   : > { %p948_p2 = pnand %p947_p1, %p1107_p5  ;;  %p954_p7 = scmp.lt.s32.totalorder %s952_s22, %s946_s25 }
 0x28c   : > { %p949_p3 = pneg %p948_p2  ;;  %p955_p8 = por %p954_p7, %p953_p4 }
 0x28e   : > { %p956_p9 = pnand %p955_p8, %p949_p3 }
 0x303   : > { %v623_v47 = vpop.xlane.xlu0 %622 }
 0x304   : > { %916 = vrcp.f32 %v623_v47 }
 0x30e   : > { %v917_v48 = vpop.eup %916 }
 0x30f   : > { %v625_v49 = vmul.f32 %v917_v48, %v915_v45 }
 0x311   : > { %627 = vst.msk [vmem:[%s347_s16] sm:$0xff] %vm614_vm3, %v625_v49 }
 0x312   : > { %959 = shalt.err (!%p956_p9)
}
 0x313   : > { %s960_s27 = scalar_lea.hbm %s1227_s21, 128  ;;  %s964_s14 = scalar_lea.hbm %s1280_s9, 256 }
 0x314   : > { %p961_p10 = scmp.ne.s32.totalorder %s1227_s21, %s960_s27  ;;  %p965_p13 = scmp.lt.u32.totalorder %s1227_s21, %s1280_s9 }
 0x315   : > { %p966_p0 = scmp.lt.u32.totalorder %s964_s14, %s960_s27  ;;  %p968_p2 = scmp.lt.u32.totalorder %s960_s27, %s1227_s21 }
 0x316   : > { %p962_p11 = pnand %p961_p10, %p1107_p5 }
 0x317   : > { %p967_p1 = por %p966_p0, %p965_p13 }
 0x318   : > { %p963_p12 = pneg %p962_p11 }
 0x319   : > { %p969_p3 = por %p968_p2, %p967_p1 }
 0x31b   : > { %p970_p4 = pnand %p969_p3, %p963_p12 }
 0x31d   : > { %973 = shalt.err (!%p970_p4)
}
 0x31e   : > { %868 = dma.vmem_to_hbm [thread:$0]  (%p1107_p5), %s1229_s23, 128, %s1227_s21, %s634_s26  }
 0x31f PF: > { %p878_p7 = scmp.ge.s32.totalorder %s1012_s12, 2  ;;  %s672_s25 = sand.u32 1, %s1000_s30  }
 0x320   : > { %s673_s29 = scalar_lea.sflag [#allocation3], %s672_s25 }
 0x321   : > { %p872_p8 = pnand %p878_p7, %p1111_p6 }
 0x323   : > { %991 = dma.done.wait (!%p872_p8), %s673_s29, 128  }
 0x324   : > { %993 = vsyncadd (!%p872_p8), %s673_s29, 4294967168  ;;  %s682_s13 = scalar_lea.sflag [#allocation5], %s672_s25 }
 0x325   : > { %995 = dma.done.wait (!%p872_p8), %s682_s13, 128  }
 0x326   : > { %997 = vsyncadd (!%p872_p8), %s682_s13, 4294967168  ;;  %p23_p5 = scmp.ge.s32.totalorder %s1094_s15, 4   ;;  %s1287_s30 = smov %s1004_s10 }
 0x327   : > { %s1288_s10 = smov %s1008_s11  ;;  %s1289_s11 = smov %s1105_s18 }
 0x328   : > { %s1290_s12 = smov %s1094_s15  ;;  %25 = sbr.rel (!%p23_p5) target bundleno = 5 (0x5), region = 107 }
 0x32f   :  { %687 = vsyncpa [#allocation3], 1 }
 0x330   :  { %689 = vsyncpa [#allocation3 + $0x1], 1 }
 0x331   :  { %690 = vsyncpa [#allocation5], 1 }
 0x332   :  { %692 = vsyncpa [#allocation5 + $0x1], 1 }

</bundles_post_ra>
